<compile_context>
chip_gen: v6e
topology: v6e:2x2x1
jax: 0.10.0
libtpu: 0.0.40
codegen_flags: <defaults>
</compile_context>

<pallas_src>
import functools

import jax
import jax.numpy as jnp
from jax.experimental import pallas as pl
from jax.experimental.pallas import tpu as pltpu

# Deterministic "parameters" from the module __init__ (YOLACT MEANS / STD, BGR order).
MEANS = (103.94, 116.78, 123.68)
STD = (57.38, 57.12, 58.40)

# cfg.backbone.transform flags (YOLACT base config: normalize=True).
TRANSFORM_NORMALIZE = True
TRANSFORM_SUBTRACT_MEANS = False
TRANSFORM_TO_FLOAT = False
TRANSFORM_CHANNEL_ORDER = "RGB"

# ~512K elements per block -> ~2 MiB (f32) per output buffer per grid step.
_TARGET_BLOCK_ELEMS = 512 * 1024
# Scoped VMEM budget: > v5e's 16 MiB default, < v7x's 64 MiB physical per TC.
_VMEM_LIMIT_BYTES = 32 * 1024 * 1024


def _fast_base_transform_kernel(x_ref, o_ref, *, scale, bias):
    # x_ref / o_ref: (1, 1, th, W) tiles.  The input index_map has already
    # gathered input channel (2 - c) for output channel c (BGR -> RGB), so the
    # per-channel constants are indexed by the *output* channel grid index.
    c = pl.program_id(1)
    s = jnp.where(c == 0, scale[0], jnp.where(c == 1, scale[1], scale[2]))
    b = jnp.where(c == 0, bias[0], jnp.where(c == 1, bias[1], bias[2]))
    # Cast to f32 on the VMEM tile (keeps the wrapper transpose and the HBM
    # input read in the narrow native dtype for uint8 / bf16 inputs).
    o_ref[...] = x_ref[...].astype(jnp.float32) * s + b


def fast_base_transform(img_nhwc, *, target_block_elems=_TARGET_BLOCK_ELEMS):
    """img_nhwc: (N, H, W, 3) -> (N, 3, H, W) float32 (normalized, BGR->RGB)."""
    if TRANSFORM_CHANNEL_ORDER != "RGB":
        raise NotImplementedError

    N, H, W, C = img_nhwc.shape
    assert C == 3

    # Fold the config branches into out = x * scale + bias with compile-time
    # Python floats (scale = 1/std, bias = -mean/std), then re-index the three
    # constants by *output* channel (output channel c reads input channel 2-c).
    if TRANSFORM_NORMALIZE:
        mean, std = MEANS, STD
    elif TRANSFORM_SUBTRACT_MEANS:
        mean, std = MEANS, (1.0, 1.0, 1.0)
    elif TRANSFORM_TO_FLOAT:
        mean, std = (0.0, 0.0, 0.0), (255.0, 255.0, 255.0)
    else:
        mean, std = (0.0, 0.0, 0.0), (1.0, 1.0, 1.0)

    scale_in = tuple(1.0 / s for s in std)
    bias_in = tuple(-m / s for m, s in zip(mean, std))
    scale = tuple(scale_in[2 - c] for c in range(3))   # output-channel order
    bias = tuple(bias_in[2 - c] for c in range(3))     # output-channel order

    # Layout plumbing in the input's native dtype (no f32 cast before the
    # transpose): img.permute(0, 3, 1, 2).contiguous().
    x = jnp.transpose(img_nhwc, (0, 3, 1, 2))          # (N, C, H, W)

    # Row-tile sizing: th a multiple of 8 (or the full H), block ~target elems.
    if H * W <= target_block_elems or H <= 8:
        th = H
    else:
        th = max(8, (min(H, target_block_elems // W) // 8) * 8)
    n_row = pl.cdiv(H, th)
    grid = (N, C, n_row)

    in_bytes = N * C * H * W * x.dtype.itemsize
    out_bytes = N * C * H * W * 4

    out = pl.pallas_call(
        functools.partial(_fast_base_transform_kernel, scale=scale, bias=bias),
        out_shape=jax.ShapeDtypeStruct((N, C, H, W), jnp.float32),
        grid=grid,
        in_specs=[
            # BGR -> RGB purely via the input index_map:
            # output channel c reads input channel (2 - c).
            pl.BlockSpec((1, 1, th, W), lambda n, c, r: (n, 2 - c, r, 0)),
        ],
        out_specs=pl.BlockSpec((1, 1, th, W), lambda n, c, r: (n, c, r, 0)),
        compiler_params=pltpu.CompilerParams(
            # Pure streaming op, no cross-step carry: all axes parallel so v7x
            # can shard grid steps across its 2 TensorCores.
            dimension_semantics=("parallel", "parallel", "parallel"),
            vmem_limit_bytes=_VMEM_LIMIT_BYTES,
        ),
        cost_estimate=pl.CostEstimate(
            flops=2 * N * C * H * W,
            transcendentals=0,
            bytes_accessed=in_bytes + out_bytes,
        ),
    )(x)

    return out


def _reference(img_nhwc):
    x = jnp.transpose(img_nhwc.astype(jnp.float32), (0, 3, 1, 2))
    mean = jnp.asarray(MEANS, dtype=jnp.float32)[None, :, None, None]
    std = jnp.asarray(STD, dtype=jnp.float32)[None, :, None, None]
    x = (x - mean) / std
    return x[:, (2, 1, 0), :, :]


if __name__ == "__main__":
    key0, key1 = jax.random.split(jax.random.PRNGKey(0))

    # Test 1: small image-like input, full channel plane per grid step.
    img = jax.random.uniform(key0, (2, 16, 16, 3), dtype=jnp.float32) * 255.0
    out = jax.block_until_ready(fast_base_transform(img))
    ref = _reference(img)
    assert out.shape == (2, 3, 16, 16)
    assert out.dtype == jnp.float32
    assert jnp.allclose(out, ref, atol=1e-4, rtol=1e-5)

    # Test 2: exercise the row-tiled + masked-tail path (H not a multiple of
    # the row tile) by forcing a tiny per-step block budget.
    img2 = jax.random.uniform(key1, (1, 20, 16, 3), dtype=jnp.float32) * 255.0
    out2 = jax.block_until_ready(fast_base_transform(img2, target_block_elems=128))
    ref2 = _reference(img2)
    assert out2.shape == (1, 3, 20, 16)
    assert out2.dtype == jnp.float32
    assert jnp.allclose(out2, ref2, atol=1e-4, rtol=1e-5)

    print("KERNEL_OK")
</pallas_src>

<mosaic_0001>
module attributes {stable_mosaic.version = 11 : i64} {
  func.func @_fast_base_transform_kernel(%arg0: i32, %arg1: i32, %arg2: i32, %arg3: memref<1x1x16x16xf32, #tpu.memory_space<vmem>>, %arg4: memref<1x1x16x16xf32, #tpu.memory_space<vmem>>) attributes {dimension_semantics = [#tpu.dimension_semantics<parallel>, #tpu.dimension_semantics<parallel>, #tpu.dimension_semantics<parallel>], iteration_bounds = array<i64: 2, 3, 1>, scalar_prefetch = 0 : i64, scratch_operands = 0 : i64, tpu.core_type = #tpu.core_type<tc>, window_params = [{transform_indices = @transform_0, window_bounds = array<i64: 1, 1, 16, 16>}, {transform_indices = @transform_1, window_bounds = array<i64: 1, 1, 16, 16>}]} {
    %c0_i32 = arith.constant 0 : i32
    %0 = arith.cmpi eq, %arg1, %c0_i32 : i32
    %c1_i32 = arith.constant 1 : i32
    %1 = arith.cmpi eq, %arg1, %c1_i32 : i32
    %cst = arith.constant 0.0175070036 : f32
    %cst_0 = arith.constant 0.0174276754 : f32
    %2 = arith.select %1, %cst, %cst_0 : f32
    %cst_1 = arith.constant 0.0171232875 : f32
    %3 = arith.select %0, %cst_1, %2 : f32
    %c0_i32_2 = arith.constant 0 : i32
    %4 = arith.cmpi eq, %arg1, %c0_i32_2 : i32
    %c1_i32_3 = arith.constant 1 : i32
    %5 = arith.cmpi eq, %arg1, %c1_i32_3 : i32
    %cst_4 = arith.constant -2.04446769 : f32
    %cst_5 = arith.constant -1.8114326 : f32
    %6 = arith.select %5, %cst_4, %cst_5 : f32
    %cst_6 = arith.constant -2.1178081 : f32
    %7 = arith.select %4, %cst_6, %6 : f32
    %c0 = arith.constant 0 : index
    %c0_7 = arith.constant 0 : index
    %c0_8 = arith.constant 0 : index
    %c0_9 = arith.constant 0 : index
    %8 = vector.load %arg3[%c0, %c0_7, %c0_8, %c0_9] : memref<1x1x16x16xf32, #tpu.memory_space<vmem>>, vector<1x1x16x16xf32>
    %9 = vector.broadcast %3 : f32 to vector<1x1x16x16xf32>
    %10 = arith.mulf %8, %9 : vector<1x1x16x16xf32>
    %11 = vector.broadcast %7 : f32 to vector<1x1x16x16xf32>
    %12 = arith.addf %10, %11 : vector<1x1x16x16xf32>
    %c0_10 = arith.constant 0 : index
    %c0_11 = arith.constant 0 : index
    %c0_12 = arith.constant 0 : index
    %c0_13 = arith.constant 0 : index
    %13 = vector.load %arg4[%c0_10, %c0_11, %c0_12, %c0_13] : memref<1x1x16x16xf32, #tpu.memory_space<vmem>>, vector<1x1x16x16xf32>
    tpu.vector_store %arg4[%c0_10, %c0_11, %c0_12, %c0_13], %12 {strides = array<i32>} : memref<1x1x16x16xf32, #tpu.memory_space<vmem>>, vector<1x1x16x16xf32>,
    return
  }
  func.func @transform_0(%arg0: i32, %arg1: i32, %arg2: i32) -> (i32, i32, i32, i32) {
    %c2_i32 = arith.constant 2 : i32
    %0 = arith.subi %c2_i32, %arg1 : i32
    %c0_i32 = arith.constant 0 : i32
    %c0_i32_0 = arith.constant 0 : i32
    return %arg0, %0, %arg2, %c0_i32 : i32, i32, i32, i32
  }
  func.func @transform_1(%arg0: i32, %arg1: i32, %arg2: i32) -> (i32, i32, i32, i32) {
    %c0_i32 = arith.constant 0 : i32
    %c0_i32_0 = arith.constant 0 : i32
    return %arg0, %arg1, %arg2, %c0_i32 : i32, i32, i32, i32
  }
}

</mosaic_0001>

<bundles_post_ra>
// kernel: tpu_custom_call.1
= control target key start
LH: loop header
LB: loop body
LE: loop exit
PB: predicated region body
PF: predicated region fallthrough
CT: control target
= control target key end

     0   :  { %6 = vsyncpa [#allocation3], 0  ;;  %s801_s0 = inlined_call_operand.hbm [shape: f32[2,3,16,16], index: 0, kind: input, shape index: {}]   ;;  %s802_s1 = inlined_call_operand.hbm [shape: f32[2,3,16,16], index: 1, kind: output, shape index: {}]  }
   0x1   :  { %8 = vsyncpa [#allocation3 + $0x1], 0 }
   0x2   :  { %9 = vsyncpa [#allocation4], 0 }
   0x3   :  { %11 = vsyncpa [#allocation4 + $0x1], 0  ;;  %s593_s6 = smov 0   ;;  %s595_s7 = smov 0  }
   0x4   :  { %s597_s8 = smov 0   ;;  %s599_s9 = smov 0  }
   0x5   :  { %s601_s10 = smov 0   ;;  %s603_s11 = smov 0  }
   0x6   :  { %s605_s12 = smov 0   ;;  %s607_s13 = smov 0  }
   0x7   :  { %s609_s14 = smov 0   ;;  %s611_s15 = smov 0  }
   0x8   :  { %s613_s16 = smov 0  }
   0x9 LB: > { %s304_s17 = sadd.s32 4294967295, %s575_s16   ;;  %s305_s18 = sadd.s32 4294967294, %s575_s16   ;;  %s575_s16 = sphi %s613_s16, %s17_s16   ;;  %s571_s15 = sphi %s611_s15, %s825_s15   ;;  %s567_s14 = sphi %s609_s14, %s824_s14   ;;  %s563_s13 = sphi %s607_s13, %s823_s13   ;;  %s559_s12 = sphi %s605_s12, %s822_s12   ;;  %s555_s11 = sphi %s603_s11, %s821_s11   ;;  %s551_s10 = sphi %s601_s10, %s820_s10   ;;  %s547_s9 = sphi %s599_s9, %s819_s9   ;;  %s543_s8 = sphi %s597_s8, %s818_s8   ;;  %s539_s7 = sphi %s595_s7, %s817_s7   ;;  %s535_s6 = sphi %s593_s6, %s816_s6  }
   0xa   : > { %s32_s19 = sadd.s32 1, %s567_s14  ;;  %s36_s20 = sadd.s32 1, %s571_s15 }
   0xb   : > { %p34_p0 = scmp.ge.s32.totalorder %s32_s19, 3  ;;  %s40_s21 = ssub.s32 2, %s567_s14 }
   0xc   : > { %s49_s22 = sadd.s32 1, %s555_s11  ;;  %p56_p1 = scmp.ne.s32.totalorder %s555_s11, %s551_s10 }
   0xd   : > { %s827_s19 = smov (%p34_p0, %s32_s19), 0  ;;  %s829_s20 = smov (!%p34_p0, %s36_s20), %s571_s15 }
   0xe   : > { %805 = sst [smem:[#allocation8_spill]] %s827_s19  ;;  %s41_s23 = ssub.s32 2, %s827_s19 }
   0xf   : > { %p57_p2 = scmp.eq.s32.totalorder %s575_s16, 0  ;;  %p38_p3 = scmp.ge.s32.totalorder %s829_s20, 2 }
  0x10   : > { %s43_s24 = ssub.s32 %s40_s21, %s41_s23  ;;  %p62_p5 = scmp.ne.s32.totalorder %s551_s10, %s547_s9 }
  0x11   : > { %p663_p4 = por %p57_p2, %p56_p1  ;;  %s831_s20 = smov (%p38_p3, %s829_s20), 0 }
  0x12   : > { %807 = sst [smem:[#allocation9_spill]] %s831_s20  ;;  %p63_p6 = scmp.eq.s32.totalorder %s304_s17, 0 }
  0x13   : > { %s73_s26 = ssub.s32 %s567_s14, %s827_s19  ;;  %s42_s27 = ssub.s32 %s571_s15, %s831_s20 }
  0x14   : > { %s79_s28 = sadd.s32 1, %s543_s8  ;;  %s44_s29 = sor.u32 %s43_s24, %s42_s27 }
  0x15   : > { %p678_p7 = por %p63_p6, %p62_p5  ;;  %p47_p8 = scmp.eq.s32.totalorder %s44_s29, 0 }
  0x16   : > { %s74_s2 = sor.u32 %s73_s26, %s42_s27  ;;  %p89_p10 = scmp.ne.s32.totalorder %s543_s8, %s539_s7 }
  0x17   : > { %p77_p9 = scmp.eq.s32.totalorder %s74_s2, 0  ;;  %p90_p11 = scmp.eq.s32.totalorder %s304_s17, 5 }
  0x18   : > { %s685_s3 = scalar_select %p47_p8, %s555_s11, %s49_s22  }
  0x19   : > { %s688_s4 = scalar_select %p77_p9, %s543_s8, %s79_s28  }
  0x1a   : > { %809 = sst [smem:[#allocation10_spill]] %s685_s3  ;;  %p95_p12 = scmp.ne.s32.totalorder %s539_s7, %s535_s6 }
  0x1b   : > { %p96_p13 = scmp.eq.s32.totalorder %s305_s18, 5  ;;  %p696_p0 = por %p90_p11, %p89_p10 }
  0x1c   : > { %p333_p1 = scmp.lt.s32.totalorder %s575_s16, 6  ;;  %s116_s23 = sand.u32 1, %s555_s11  }
  0x1d   : > { %p701_p2 = por %p96_p13, %p95_p12  ;;  %s308_s24 = sshll.u32 %s116_s23, 4 }
  0x1e   : > { %s309_s22 = sshll.u32 %s40_s21, 1  ;;  %s319_s26 = smul.u32 6, %s571_s15 }
  0x1f   : > { %s120_s27 = scalar_lea.vmem [#allocation2], %s308_s24  ;;  %p711_p3 = pnand %p333_p1, %p663_p4 }
  0x20   : > { %s132_s28 = sshll.u32 %s120_s27, 4  ;;  %s129_s18 = sadd.s32 %s319_s26, %s309_s22  ;;  %s133_s28 = int_to_ptr.vmem [resolvable:$true] %s132_s28 }
  0x21   : > { %s310_s29 = sshll.u32 %s129_s18, 7  ;;  %s117_s3 = scalar_lea.sflag [#allocation3], %s116_s23 }
  0x22   : > { %s131_s19 = scalar_lea.hbm %s801_s0, %s310_s29  ;;  %p429_p5 = pneg %p711_p3 }
  0x23   : > { %s440_s21 = scalar_lea.vmem %s133_s28, 256  ;;  %s577_s24 = smov [#allocation2]  }
  0x24   : > { %p441_p6 = scmp.ne.s32.totalorder %s133_s28, %s440_s21  ;;  %s445_s25 = sshll.u32 %s577_s24, 4  ;;  %s446_s25 = int_to_ptr.vmem [resolvable:$false] %s445_s25 }
  0x25   : > { %s447_s27 = scalar_lea.vmem %s446_s25, 512  ;;  %p448_p4 = scmp.lt.s32.totalorder %s133_s28, %s446_s25 }
  0x26   : > { %p443_p8 = pnand %p441_p6, %p429_p5  ;;  %p449_p10 = scmp.lt.s32.totalorder %s447_s27, %s440_s21 }
  0x28   : > { %p444_p9 = pneg %p443_p8  ;;  %p450_p11 = por %p449_p10, %p448_p4 }
  0x2a   : > { %p451_p12 = pnand %p450_p11, %p444_p9 }
  0x2c   : > { %454 = shalt.err (!%p451_p12)
}
  0x2d   : > { %s578_s22 = smov 128   ;;  %s579_s20 = smov 8  }
  0x2e   : > { %328 = dma.hbm_to_vmem [thread:$0]  (!%p711_p3), %s131_s19, 256, %s133_s28, %s117_s3, %s578_s22, %s578_s22, %s579_s20  }
  0x2f   : > { %p311_p13 = scmp.ge.s32.totalorder %s575_s16, 1  ;;  %p140_p1 = scmp.lt.s32.totalorder %s575_s16, 7 }
  0x31   : > { %p141_p5 = pnand %p311_p13, %p140_p1 }
  0x32   : > { %s146_s23 = sand.u32 (!%p141_p5), 1, %s551_s10  }
  0x33   : > { %144 = sbr.rel (%p141_p5) target bundleno = 89 (0x59), region = 24  ;;  %s312_s26 = sshll.u32 (!%p141_p5), %s146_s23, 4 }
  0x34   : > { %s147_s18 = scalar_lea.sflag (!%p141_p5), [#allocation3], %s146_s23  ;;  %s150_s29 = scalar_lea.vmem (!%p141_p5), [#allocation2], %s312_s26 }
  0x38   : > { %526 = dma.done.wait (%p678_p7), %s147_s18, 256  }
  0x39   : > { %528 = vsyncadd (%p678_p7), %s147_s18, 4294967040  ;;  %s166_s19 = sand.u32 1, %s539_s7   ;;  %p172_p3 = scmp.eq.s32.totalorder %s559_s12, 0  ;;  %v178_v0 = vld [vmem:[%s150_s29] sm:$0xff]  ;;  %v179_v2 = vld [vmem:[%s150_s29 + $0x8] sm:$0xff]  ;;  %vm186_vm0 = vcmask 130048  }
  0x3a   : > { %s313_s3 = sshll.u32 %s166_s19, 4  ;;  %p173_p6 = scmp.eq.s32.totalorder %s559_s12, 1 }
  0x3b   : > { %s168_s2 = scalar_lea.vmem [#allocation5], %s313_s3  ;;  %s315_s30 = sshll.u32 %s559_s12, 1 }
  0x3c   : > { %s174_s28 = scalar_select %p173_p6, 0.017507004, 0.017427675 }
  0x3d   : > { %s176_s17 = scalar_select %p173_p6, -2.0444677, -1.8114326 }
  0x3e   : > { %s833_s28 = smov (%p172_p3, %s174_s28), 0.017123288  ;;  %s207_s21 = sshll.u32 %s168_s2, 4  ;;  %s734_s21 = int_to_ptr.vmem [resolvable:$true] %s207_s21 }
  0x3f   : > { %s835_s17 = smov (%p172_p3, %s176_s17), -2.117808  ;;  %v180_v1 = vstv %s833_s28  ;;  %s320_s24 = smul.u32 6, %s563_s13 }
  0x40   : > { %v181_v3 = vmul.f32 %v180_v1, %v178_v0  ;;  %v183_v4 = vstv %s835_s17  ;;  %v182_v5 = vmul.f32 %v180_v1, %v179_v2  ;;  %s741_s23 = scalar_lea.sflag [#allocation4], %s166_s19  ;;  %s455_s13 = scalar_lea.vmem %s734_s21, 256 }
  0x41   : > { %s204_s25 = sadd.s32 %s320_s24, %s315_s30  ;;  %p456_p7 = scmp.ne.s32.totalorder %s734_s21, %s455_s13 }
  0x42   : > { %v184_v6 = vadd.f32 %v183_v4, %v181_v3  ;;  %v185_v7 = vadd.f32 %v183_v4, %v182_v5  ;;  %s316_s27 = sshll.u32 %s204_s25, 7  ;;  %s580_s26 = smov [#allocation5]  }
  0x43   : > { %s739_s12 = scalar_lea.hbm %s802_s1, %s316_s27  ;;  %p457_p8 = pnand %p456_p7, %p696_p0 }
  0x44   : > { %187 = vst.msk [vmem:[%s168_s2] sm:$0xff] %vm186_vm0, %v184_v6  ;;  %188 = vst.msk [vmem:[%s168_s2 + $0x8] sm:$0xff] %vm186_vm0, %v185_v7  ;;  %s459_s18 = sshll.u32 %s580_s26, 4  ;;  %s460_s18 = int_to_ptr.vmem [resolvable:$false] %s459_s18 }
  0x45   : > { %p458_p9 = pneg %p457_p8  ;;  %s461_s29 = scalar_lea.vmem %s460_s18, 512 }
  0x46   : > { %p462_p4 = scmp.lt.s32.totalorder %s734_s21, %s460_s18  ;;  %p463_p10 = scmp.lt.s32.totalorder %s461_s29, %s455_s13 }
  0x48   : > { %p464_p11 = por %p463_p10, %p462_p4 }
  0x4a   : > { %p465_p12 = pnand %p464_p11, %p458_p9 }
  0x4c   : > { %468 = shalt.err (!%p465_p12)
}
  0x4d   : > { %s469_s19 = scalar_lea.hbm %s739_s12, 256  ;;  %s473_s17 = scalar_lea.hbm %s802_s1, 1536 }
  0x4e   : > { %p470_p13 = scmp.ne.s32.totalorder %s739_s12, %s469_s19  ;;  %p474_p3 = scmp.lt.s32.totalorder %s739_s12, %s802_s1 }
  0x4f   : > { %p475_p6 = scmp.lt.s32.totalorder %s473_s17, %s469_s19 }
  0x50   : > { %p471_p1 = pnand %p470_p13, %p696_p0 }
  0x51   : > { %p476_p7 = por %p475_p6, %p474_p3 }
  0x52   : > { %p472_p5 = pneg %p471_p1 }
  0x54   : > { %p477_p8 = pnand %p476_p7, %p472_p5 }
  0x56   : > { %480 = shalt.err (!%p477_p8)
}
  0x57   : > { %s581_s24 = smov 128   ;;  %s582_s25 = smov 8  }
  0x58   : > { %323 = dma.vmem_to_hbm [thread:$0]  (%p696_p0), %s734_s21, 256, %s739_s12, %s741_s23, %s581_s24, %s581_s24, %s582_s25  }
  0x59 PF: > { %p334_p9 = scmp.ge.s32.totalorder %s575_s16, 2  ;;  %s222_s27 = sand.u32 1, %s535_s6  }
  0x5a   : > { %s223_s22 = scalar_lea.sflag [#allocation4], %s222_s27 }
  0x5b   : > { %p330_p4 = pnand %p334_p9, %p701_p2 }
  0x5d   : > { %p331_p10 = pneg %p330_p4 }
  0x5f   : > { %530 = dma.done.wait (%p331_p10), %s223_s22, 256  }
  0x60   : > { %532 = vsyncadd (%p331_p10), %s223_s22, 4294967040  ;;  %s17_s16 = sadd.s32 1, %s575_s16   ;;  %s813_s5 = sld [smem:[#allocation10_spill]] }
  0x61   : > { %p14_p11 = scmp.ge.s32.totalorder %s17_s16, 8   ;;  %s814_s21 = sld [smem:[#allocation8_spill]] }
  0x62   : > { %s815_s20 = sld [smem:[#allocation9_spill]]  ;;  %s816_s6 = smov %s539_s7 }
  0x63   : > { %s817_s7 = smov %s543_s8  ;;  %s818_s8 = smov %s688_s4 }
  0x64   : > { %s819_s9 = smov %s551_s10  ;;  %s820_s10 = smov %s555_s11 }
  0x65   : > { %s822_s12 = smov %s567_s14  ;;  %s823_s13 = smov %s571_s15 }
  0x66   : > { %s821_s11 = smov %s813_s5  ;;  %16 = sbr.rel (!%p14_p11) target bundleno = 9 (0x9), region = 69 }
  0x67   : > { %s824_s14 = smov %s814_s21 }
  0x68   : > { %s825_s15 = smov %s815_s20 }
  0x6b   :  { %228 = vsyncpa [#allocation3], 1 }
  0x6c   :  { %230 = vsyncpa [#allocation3 + $0x1], 1 }
  0x6d   :  { %231 = vsyncpa [#allocation4], 1 }
  0x6e   :  { %233 = vsyncpa [#allocation4 + $0x1], 1 }

</bundles_post_ra>
